<compile_context>
chip_gen: v7x
topology: tpu7x:2x2x1
jax: 0.10.0
libtpu: 0.0.40
codegen_flags: <defaults>
</compile_context>

<pallas_src>
import jax
import jax.numpy as jnp
from jax.experimental import pallas as pl
from jax.experimental.pallas import tpu as pltpu

LAYER_DIMS = [(5, 20), (20, 20), (20, 4)]
IN_PAD = 8      # input features 5 -> 8 sublanes
OUT_PAD = 8     # output features 4 -> 8 sublanes
FPAD = 32       # hidden/weight feature pad (holds max dim 20, multiple of 8)
LANE = 128      # batch (lane axis) granularity


def _round_up(x, m):
    return -(-x // m) * m


def mlp_kernel(x_ref, w_ref, b_ref, o_ref):
    # x_ref: [8, tb]        x^T  (rows 0..4 real, 5..7 zero)
    # w_ref: [3, 32, 32]    W^T slabs, zero padded
    # b_ref: [3, 32, 1]     bias slabs, zero padded
    # o_ref: [8, tb]        out^T (rows 0..3 real)
    xT = x_ref[...]

    # Layer 1: h1^T = relu(W1^T @ x^T + b1)   ([32,8] @ [8,tb])
    w0 = w_ref[0]
    h = jnp.dot(w0[:, :IN_PAD], xT, preferred_element_type=jnp.float32)
    h = jnp.maximum(h + b_ref[0], 0.0)

    # Layer 2: h2^T = relu(W2^T @ h1^T + b2)  ([32,32] @ [32,tb])
    h = jnp.dot(w_ref[1], h, preferred_element_type=jnp.float32)
    h = jnp.maximum(h + b_ref[1], 0.0)

    # Layer 3: out^T = W3^T @ h2^T + b3       ([8,32] @ [32,tb])
    w2 = w_ref[2]
    b2 = b_ref[2]
    out = jnp.dot(w2[:OUT_PAD, :], h, preferred_element_type=jnp.float32)
    o_ref[...] = (out + b2[:OUT_PAD, :]).astype(o_ref.dtype)


def mlp_forward(x, w_packed, b_packed, *, tile_b=1024):
    """x: [batch, 5] float32. Returns [batch, 4]."""
    batch, in_dim = x.shape
    out_dim = LAYER_DIMS[-1][1]

    # Batch lives on the lane axis: pad only to a multiple of 128.
    padded_batch = _round_up(max(batch, 1), LANE)

    # Tile size: big enough to amortize per-step overhead, but keep >= 2 tiles
    # when possible so v7x's two TensorCores both get work.
    if padded_batch >= 2 * LANE:
        half = max(LANE, (padded_batch // 2) // LANE * LANE)
        tb = min(tile_b, half)
    else:
        tb = padded_batch
    num_tiles = pl.cdiv(padded_batch, tb)

    # Build x^T: [8, padded_batch], zeros outside the real (5, batch) region.
    x_pad = jnp.zeros((IN_PAD, padded_batch), x.dtype).at[:in_dim, :batch].set(x.T)

    out_pad = pl.pallas_call(
        mlp_kernel,
        out_shape=jax.ShapeDtypeStruct((OUT_PAD, padded_batch), x.dtype),
        grid=(num_tiles,),
        in_specs=[
            pl.BlockSpec((IN_PAD, tb), lambda i: (0, i)),        # x^T: tiled over batch lanes
            pl.BlockSpec((3, FPAD, FPAD), lambda i: (0, 0, 0)),  # weights: resident
            pl.BlockSpec((3, FPAD, 1), lambda i: (0, 0, 0)),     # biases: resident
        ],
        out_specs=pl.BlockSpec((OUT_PAD, tb), lambda i: (0, i)),  # out^T: lane-dense
        compiler_params=pltpu.CompilerParams(
            dimension_semantics=("parallel",)),
    )(x_pad, w_packed, b_packed)

    return out_pad[:out_dim, :batch].T


def init_params(key):
    # Mimic PyTorch nn.Linear default init: U(-1/sqrt(fan_in), 1/sqrt(fan_in)).
    # Weights stored as [in, out] (transposed vs PyTorch's [out, in]).
    params = []
    for (fan_in, fan_out) in LAYER_DIMS:
        key, kw, kb = jax.random.split(key, 3)
        bound = 1.0 / jnp.sqrt(jnp.float32(fan_in))
        w = jax.random.uniform(kw, (fan_in, fan_out), jnp.float32,
                               minval=-bound, maxval=bound)
        b = jax.random.uniform(kb, (fan_out,), jnp.float32,
                               minval=-bound, maxval=bound)
        params += [w, b]
    return params


def pack_params(w1, b1, w2, b2, w3, b3):
    """Pre-transpose and zero-pad: weights -> [3,32,32] (W^T), biases -> [3,32,1]."""
    w_packed = jnp.zeros((3, FPAD, FPAD), jnp.float32)
    b_packed = jnp.zeros((3, FPAD, 1), jnp.float32)
    for i, (w, b) in enumerate(((w1, b1), (w2, b2), (w3, b3))):
        fin, fout = w.shape
        w_packed = w_packed.at[i, :fout, :fin].set(w.T)      # store W^T
        b_packed = b_packed.at[i, :fout, 0].set(b)
    return w_packed, b_packed


def reference_forward(x, w1, b1, w2, b2, w3, b3):
    h1 = jnp.maximum(x @ w1 + b1, 0.0)
    h2 = jnp.maximum(h1 @ w2 + b2, 0.0)
    return h2 @ w3 + b3


if __name__ == "__main__":
    key = jax.random.PRNGKey(0)
    key, kx = jax.random.split(key)
    batch = 8
    x = jax.random.normal(kx, (batch, 5), jnp.float32)

    params = init_params(key)              # unpadded, PyTorch-equivalent params
    w_packed, b_packed = pack_params(*params)

    out = mlp_forward(x, w_packed, b_packed)
    out = jax.block_until_ready(out)

    ref = reference_forward(x, *params)
    assert out.shape == (batch, 4), out.shape
    assert jnp.allclose(out, ref, atol=1e-5, rtol=1e-5), "mismatch vs reference"

    print("KERNEL_OK")
</pallas_src>

<mosaic_0001>
module attributes {stable_mosaic.version = 11 : i64} {
  func.func @mlp_kernel(%arg0: i32, %arg1: memref<8x128xf32, #tpu.memory_space<vmem>>, %arg2: memref<3x32x32xf32, #tpu.memory_space<vmem>>, %arg3: memref<3x32x1xf32, #tpu.memory_space<vmem>>, %arg4: memref<8x128xf32, #tpu.memory_space<vmem>>) attributes {dimension_semantics = [#tpu.dimension_semantics<parallel>], iteration_bounds = array<i64: 1>, scalar_prefetch = 0 : i64, scratch_operands = 0 : i64, tpu.core_type = #tpu.core_type<tc>, window_params = [{transform_indices = @transform_0, window_bounds = array<i64: 8, 128>}, {pipeline_mode = #tpu.pipeline_mode<synchronous>, transform_indices = @transform_1, window_bounds = array<i64: 3, 32, 32>}, {pipeline_mode = #tpu.pipeline_mode<synchronous>, transform_indices = @transform_2, window_bounds = array<i64: 3, 32, 1>}, {transform_indices = @transform_3, window_bounds = array<i64: 8, 128>}]} {
    %c0 = arith.constant 0 : index
    %c0_0 = arith.constant 0 : index
    %0 = vector.load %arg1[%c0, %c0_0] : memref<8x128xf32, #tpu.memory_space<vmem>>, vector<8x128xf32>
    %c0_1 = arith.constant 0 : index
    %c0_2 = arith.constant 0 : index
    %c0_3 = arith.constant 0 : index
    %1 = vector.load %arg2[%c0_1, %c0_2, %c0_3] : memref<3x32x32xf32, #tpu.memory_space<vmem>>, vector<1x32x32xf32>
    %2 = vector.shape_cast %1 : vector<1x32x32xf32> to vector<32x32xf32>
    %3 = vector.extract_strided_slice %2 {offsets = [0, 0], sizes = [32, 8], strides = [1, 1]} : vector<32x32xf32> to vector<32x8xf32>
    %cst = arith.constant dense<0.000000e+00> : vector<32x128xf32>
    %4 = tpu.matmul %3, %0, %cst {dimension_numbers = #tpu.dot_dimension_numbers<[1], [0], [0], [1], [0, 0, 1, 1], [], []>} : vector<32x8xf32>, vector<8x128xf32>, vector<32x128xf32> -> vector<32x128xf32>
    %c0_4 = arith.constant 0 : index
    %c0_5 = arith.constant 0 : index
    %c0_6 = arith.constant 0 : index
    %5 = vector.load %arg3[%c0_4, %c0_5, %c0_6] : memref<3x32x1xf32, #tpu.memory_space<vmem>>, vector<1x32x1xf32>
    %6 = vector.shape_cast %5 : vector<1x32x1xf32> to vector<32x1xf32>
    %7 = vector.broadcast %6 : vector<32x1xf32> to vector<32x128xf32>
    %8 = arith.addf %4, %7 : vector<32x128xf32>
    %cst_7 = arith.constant 0.000000e+00 : f32
    %9 = vector.broadcast %cst_7 : f32 to vector<32x128xf32>
    %10 = arith.maximumf %8, %9 : vector<32x128xf32>
    %c1 = arith.constant 1 : index
    %c0_8 = arith.constant 0 : index
    %c0_9 = arith.constant 0 : index
    %11 = vector.load %arg2[%c1, %c0_8, %c0_9] : memref<3x32x32xf32, #tpu.memory_space<vmem>>, vector<1x32x32xf32>
    %12 = vector.shape_cast %11 : vector<1x32x32xf32> to vector<32x32xf32>
    %cst_10 = arith.constant dense<0.000000e+00> : vector<32x128xf32>
    %13 = tpu.matmul %12, %10, %cst_10 {dimension_numbers = #tpu.dot_dimension_numbers<[1], [0], [0], [1], [0, 0, 1, 1], [], []>} : vector<32x32xf32>, vector<32x128xf32>, vector<32x128xf32> -> vector<32x128xf32>
    %c1_11 = arith.constant 1 : index
    %c0_12 = arith.constant 0 : index
    %c0_13 = arith.constant 0 : index
    %14 = vector.load %arg3[%c1_11, %c0_12, %c0_13] : memref<3x32x1xf32, #tpu.memory_space<vmem>>, vector<1x32x1xf32>
    %15 = vector.shape_cast %14 : vector<1x32x1xf32> to vector<32x1xf32>
    %16 = vector.broadcast %15 : vector<32x1xf32> to vector<32x128xf32>
    %17 = arith.addf %13, %16 : vector<32x128xf32>
    %cst_14 = arith.constant 0.000000e+00 : f32
    %18 = vector.broadcast %cst_14 : f32 to vector<32x128xf32>
    %19 = arith.maximumf %17, %18 : vector<32x128xf32>
    %c2 = arith.constant 2 : index
    %c0_15 = arith.constant 0 : index
    %c0_16 = arith.constant 0 : index
    %20 = vector.load %arg2[%c2, %c0_15, %c0_16] : memref<3x32x32xf32, #tpu.memory_space<vmem>>, vector<1x32x32xf32>
    %21 = vector.shape_cast %20 : vector<1x32x32xf32> to vector<32x32xf32>
    %c2_17 = arith.constant 2 : index
    %c0_18 = arith.constant 0 : index
    %c0_19 = arith.constant 0 : index
    %22 = vector.load %arg3[%c2_17, %c0_18, %c0_19] : memref<3x32x1xf32, #tpu.memory_space<vmem>>, vector<1x32x1xf32>
    %23 = vector.shape_cast %22 : vector<1x32x1xf32> to vector<32x1xf32>
    %24 = vector.extract_strided_slice %21 {offsets = [0, 0], sizes = [8, 32], strides = [1, 1]} : vector<32x32xf32> to vector<8x32xf32>
    %cst_20 = arith.constant dense<0.000000e+00> : vector<8x128xf32>
    %25 = tpu.matmul %24, %19, %cst_20 {dimension_numbers = #tpu.dot_dimension_numbers<[1], [0], [0], [1], [0, 0, 1, 1], [], []>} : vector<8x32xf32>, vector<32x128xf32>, vector<8x128xf32> -> vector<8x128xf32>
    %26 = vector.extract_strided_slice %23 {offsets = [0, 0], sizes = [8, 1], strides = [1, 1]} : vector<32x1xf32> to vector<8x1xf32>
    %27 = vector.broadcast %26 : vector<8x1xf32> to vector<8x128xf32>
    %28 = arith.addf %25, %27 : vector<8x128xf32>
    %c0_21 = arith.constant 0 : index
    %c0_22 = arith.constant 0 : index
    %29 = vector.load %arg4[%c0_21, %c0_22] : memref<8x128xf32, #tpu.memory_space<vmem>>, vector<8x128xf32>
    tpu.vector_store %arg4[%c0_21, %c0_22], %28 {strides = array<i32>} : memref<8x128xf32, #tpu.memory_space<vmem>>, vector<8x128xf32>,
    return
  }
  func.func @transform_0(%arg0: i32) -> (i32, i32) {
    %c0_i32 = arith.constant 0 : i32
    %c0_i32_0 = arith.constant 0 : i32
    return %c0_i32, %arg0 : i32, i32
  }
  func.func @transform_1(%arg0: i32) -> (i32, i32, i32) {
    %c0_i32 = arith.constant 0 : i32
    %c0_i32_0 = arith.constant 0 : i32
    %c0_i32_1 = arith.constant 0 : i32
    %c0_i32_2 = arith.constant 0 : i32
    return %c0_i32, %c0_i32_0, %c0_i32_1 : i32, i32, i32
  }
  func.func @transform_2(%arg0: i32) -> (i32, i32, i32) {
    %c0_i32 = arith.constant 0 : i32
    %c0_i32_0 = arith.constant 0 : i32
    %c0_i32_1 = arith.constant 0 : i32
    %c0_i32_2 = arith.constant 0 : i32
    return %c0_i32, %c0_i32_0, %c0_i32_1 : i32, i32, i32
  }
  func.func @transform_3(%arg0: i32) -> (i32, i32) {
    %c0_i32 = arith.constant 0 : i32
    %c0_i32_0 = arith.constant 0 : i32
    return %c0_i32, %arg0 : i32, i32
  }
}

</mosaic_0001>

<bundles_post_ra>
// kernel: tpu_custom_call.1
= control target key start
LH: loop header
LB: loop body
LE: loop exit
PB: predicated region body
PF: predicated region fallthrough
CT: control target
= control target key end

     0   :  { %8 = vsyncpa [#allocation3], 0  ;;  %s641_s0 = inlined_call_operand.hbm [shape: f32[8,128], index: 0, kind: input, shape index: {}]   ;;  %s642_s1 = inlined_call_operand.vmem [shape: f32[3,32,32], index: 1, kind: input, shape index: {}]   ;;  %s643_s2 = inlined_call_operand.vmem [shape: f32[3,32,1], index: 2, kind: input, shape index: {}]   ;;  %s644_s3 = inlined_call_operand.hbm [shape: f32[8,128], index: 3, kind: output, shape index: {}]  }
   0x1   :  { %9 = vsyncpa [#allocation4], 0  ;;  %s528_s12 = smov [#allocation2]   ;;  %s480_s16 = scalar_lea.hbm %s641_s0, 128 }
   0x2   :  { %s16_s13 = sshll.u32 %s528_s12, 4  ;;  %p481_p0 = scmp.ne.s32.totalorder %s641_s0, %s480_s16  ;;  %s17_s13 = int_to_ptr.vmem [resolvable:$true] %s16_s13 }
   0x3   :  { %p484_p1 = scmp.lt.u32.totalorder %s480_s16, %s641_s0 }
   0x5   :  { %p486_p2 = pnand %p484_p1, %p481_p0 }
   0x7   :  { %489 = shalt.err (!%p486_p2)
}
   0x8   :  { %s490_s21 = scalar_lea.vmem %s17_s13, 128  ;;  %p495_p4 = scmp.lt.s32.totalorder %s17_s13, %s17_s13 }
   0x9   :  { %p491_p3 = scmp.ne.s32.totalorder %s17_s13, %s490_s21  ;;  %p496_p5 = scmp.lt.s32.totalorder %s490_s21, %s490_s21 }
   0xb   :  { %p497_p6 = por %p496_p5, %p495_p4 }
   0xd   :  { %p498_p7 = pnand %p497_p6, %p491_p3 }
   0xf   :  { %501 = shalt.err (!%p498_p7)
}
  0x10   :  { %19 = dma.hbm_to_vmem [thread:$0]  %s641_s0, 128, %s17_s13, [#allocation3]  }
  0x11   :  { %524 = dma.done.wait [#allocation3], 128  }
  0x12   :  { %525 = vsyncadd [#allocation3], 4294967168  ;;  %v529_v0 = vmov 0   ;;  %vm56_vm0 = vcmask 64512   ;;  %v27_v1 = vld [vmem:[#allocation2] sm:$0xff]  ;;  %v29_v3 = vld [vmem:[%s642_s1 + $0x8] sm:$0xff] }
  0x13   :  { %478 = vset.pattern.permute.xlu0 %v529_v0  ;;  %479 = vset.pattern.permute.xlu1 %v529_v0  ;;  %v28_v2 = vld [vmem:[%s642_s1] sm:$0xff]  ;;  %v30_v4 = vld [vmem:[%s642_s1 + $0x10] sm:$0xff]  ;;  %v33_v7 = vld [vmem:[%s643_s2 + $0x8] sm:$0xff]  ;;  %vm188_vm1 = vcmask 261120   ;;  %v530_v37 = vmov 0.0|0.0   ;;  %vm531_vm2 = vmmov 0  }
  0x14   :  { %425 = vmatprep.subr.mxu0 %v27_v1  ;;  %427 = vmatprep.mubr.msk.f32.mxu0 %vm56_vm0, %v28_v2  ;;  %v32_v5 = vld [vmem:[%s643_s2] sm:$0xff]  ;;  %v34_v6 = vld [vmem:[%s643_s2 + $0x10] sm:$0xff]  ;;  %v31_v8 = vld [vmem:[%s642_s1 + $0x18] sm:$0xff]  ;;  %v532_v38 = vmov 0.0   ;;  %s533_s30 = smov [#allocation5]  }
  0x15   :  { %426 = vmatpush3.msra.mxu0 %v27_v1  ;;  %38 = vperm.xlu0 %478, %v32_v5   ;;  %v35_v9 = vld [vmem:[%s643_s2 + $0x18] sm:$0xff]  ;;  %v396_v10 = vld [vmem:[%s643_s2 + $0x20] sm:$0xff]  ;;  %v397_v11 = vld [vmem:[%s643_s2 + $0x28] sm:$0xff]  ;;  %s379_s4 = sshll.u32 %s533_s30, 4  ;;  %s380_s4 = int_to_ptr.vmem [resolvable:$true] %s379_s4 }
  0x16   :  { %428 = vmatmul.mubr.msk.f32.vlgmr.msra.gmra.mrb[0].mxu0 %vm56_vm0, %v29_v3  ;;  %48 = vperm.xlu1 %479, %v34_v6   ;;  %v398_v12 = vld [vmem:[%s643_s2 + $0x30] sm:$0xff]  ;;  %v399_v13 = vld [vmem:[%s643_s2 + $0x38] sm:$0xff]  ;;  %v405_v14 = vld [vmem:[%s643_s2 + $0x40] sm:$0xff]  ;;  %s502_s5 = scalar_lea.vmem %s380_s4, 128  ;;  %p507_p9 = scmp.lt.s32.totalorder %s380_s4, %s380_s4 }
  0x17   :  { %430 = vmatprep.mubr.msk.f32.mxu0 %vm56_vm0, %v30_v4  ;;  %v392_v15 = vld [vmem:[%s642_s1 + $0x20] sm:$0xff]  ;;  %v393_v34 = vld [vmem:[%s642_s1 + $0x28] sm:$0xff]  ;;  %v394_v35 = vld [vmem:[%s642_s1 + $0x30] sm:$0xff]  ;;  %466 = vmatprep.subr.bf16.mxu0 %v530_v37  ;;  %p503_p8 = scmp.ne.s32.totalorder %s380_s4, %s502_s5  ;;  %p508_p10 = scmp.lt.s32.totalorder %s502_s5, %s502_s5 }
  0x18   :  { %441 = vmatprep.mubr.msk.f32.mxu1 %vm188_vm1, %v392_v15  ;;  %v395_v36 = vld [vmem:[%s642_s1 + $0x38] sm:$0xff]  ;;  %v404_v57 = vld [vmem:[%s642_s1 + $0x40] sm:$0xff] }
  0x19   :  { %43 = vperm.xlu0 %478, %v33_v7   ;;  %p509_p11 = por %p508_p10, %p507_p9 }
  0x1a   :  { %431 = vmatmul.mubr.msk.f32.gmra.mrb[2].mxu0 %vm56_vm0, %v31_v8  ;;  %53 = vperm.xlu1 %479, %v35_v9  }
  0x1b   :  { %455 = vmatprep.mubr.msk.f32.mxu0 %vm531_vm2, %v532_v38  ;;  %p510_p12 = pnand %p509_p11, %p503_p8 }
  0x1d   :  { %170 = vperm.xlu0 %478, %v396_v10  }
  0x1e   :  { %175 = vperm.xlu1 %479, %v397_v11  }
  0x21   :  { %180 = vperm.xlu0 %478, %v398_v12  }
  0x22   :  { %185 = vperm.xlu1 %479, %v399_v13  }
  0x25   :  { %296 = vperm.xlu0 %478, %v405_v14  }
  0x94   :  { %v39_v16 = vpop.permute.xlu0 %38 }
  0x95   :  { %v49_v17 = vpop.permute.xlu1 %48 }
  0x98   :  { %v44_v18 = vpop.permute.xlu0 %43 }
  0x99   :  { %v54_v24 = vpop.permute.xlu1 %53 }
  0x9c   :  { %v171_v40 = vpop.permute.xlu0 %170 }
  0x9d   :  { %v176_v39 = vpop.permute.xlu1 %175 }
  0xa0   :  { %v181_v49 = vpop.permute.xlu0 %180 }
  0xa1   :  { %v186_v46 = vpop.permute.xlu1 %185 }
  0xa4   :  { %v297_v58 = vpop.permute.xlu0 %296 }
  0xe9   :  { %v429_v19 = vpop.f32.mrb[0].mxu0 }
  0xea   :  { %v141_v20 = vadd.f32 %v429_v19, %v44_v18  ;;  %v135_v21 = vpop.f32.mrb[1].mxu0 }
  0xeb   :  { %v136_v22 = vadd.f32 %v135_v21, %v39_v16 }
  0xec   :  { %v155_v23 = vmax.f32 %v141_v20, 0.0 }
  0xed   :  { %v154_v25 = vmax.f32 %v136_v22, 0.0  ;;  %v432_v26 = vpop.f32.mrb[2].mxu0 }
  0xee   :  { %v151_v27 = vadd.f32 %v432_v26, %v54_v24  ;;  %v145_v28 = vpop.f32.mrb[3].mxu0 }
  0xef   :  { %v146_v29 = vadd.f32 %v145_v28, %v49_v17  ;;  %v458_v30 = vpack.c.bf16 %v155_v23, %v154_v25 }
  0xf0   :  { %v157_v31 = vmax.f32 %v151_v27, 0.0 }
  0xf1   :  { %v156_v32 = vmax.f32 %v146_v29, 0.0  ;;  %459 = vmatprep.subr.bf16.mxu1 %v458_v30 }
  0xf2   :  { %461 = vmatpush3.bf16.msra.mxu1 %v458_v30 }
  0xf3   :  { %v462_v33 = vpack.c.bf16 %v157_v31, %v156_v32 }
  0xf5   :  { %463 = vmatprep.subr.bf16.mxu1 %v462_v33 }
  0xf6   :  { %465 = vmatpush3.bf16.msra.mxu1 %v462_v33 }
  0xf9   :  { %442 = vmatmul.mubr.msk.f32.vlgmr.msra.gmra.mrb[0].mxu1 %vm188_vm1, %v393_v34 }
  0xfa   :  { %444 = vmatprep.mubr.msk.f32.mxu1 %vm188_vm1, %v394_v35 }
  0xfd   :  { %445 = vmatmul.mubr.msk.f32.gmra.mrb[2].mxu1 %vm188_vm1, %v395_v36 }
 0x1cc   :  { %v443_v41 = vpop.f32.mrb[0].mxu1 }
 0x1cd   :  { %v273_v42 = vadd.f32 %v443_v41, %v176_v39  ;;  %v267_v43 = vpop.f32.mrb[1].mxu1 }
 0x1ce   :  { %v268_v44 = vadd.f32 %v267_v43, %v171_v40 }
 0x1cf   :  { %v287_v45 = vmax.f32 %v273_v42, 0.0 }
 0x1d0   :  { %v286_v47 = vmax.f32 %v268_v44, 0.0  ;;  %v446_v48 = vpop.f32.mrb[2].mxu1 }
 0x1d1   :  { %v283_v50 = vadd.f32 %v446_v48, %v186_v46  ;;  %v277_v51 = vpop.f32.mrb[3].mxu1 }
 0x1d2   :  { %v467_v52 = vpack.c.bf16 %v287_v45, %v286_v47  ;;  %v278_v53 = vadd.f32 %v277_v51, %v181_v49 }
 0x1d3   :  { %v289_v54 = vmax.f32 %v283_v50, 0.0 }
 0x1d4   :  { %v288_v55 = vmax.f32 %v278_v53, 0.0  ;;  %468 = vmatpush3.bf16.msra.mxu0 %v467_v52 }
 0x1d5   :  { %469 = vmatprep.subr.bf16.mxu0 %v530_v37 }
 0x1d6   :  { %v470_v56 = vpack.c.bf16 %v289_v54, %v288_v55 }
 0x1d8   :  { %471 = vmatpush3.bf16.msra.mxu0 %v470_v56 }
 0x1db   :  { %456 = vmatmul.mubr.msk.f32.vlgmr.msra.gmra.mrb[4].mxu0 %vm188_vm1, %v404_v57 }
 0x2ae   :  { %v368_v59 = vpop.f32.mrb[4].mxu0 }
 0x2af   :  { %v369_v60 = vadd.f32 %v368_v59, %v297_v58  ;;  %v457_v61 = vpop.f32.mrb[5].mxu0 }
 0x2b1   :  { %372 = vst [vmem:[#allocation5] sm:$0xff] %v369_v60 }
 0x2b2   :  { %513 = shalt.err (!%p510_p12)
}
 0x2b3   :  { %s514_s1 = scalar_lea.hbm %s644_s3, 128 }
 0x2b4   :  { %p515_p13 = scmp.ne.s32.totalorder %s644_s3, %s514_s1  ;;  %p518_p0 = scmp.lt.u32.totalorder %s514_s1, %s644_s3 }
 0x2b6   :  { %p520_p1 = pnand %p518_p0, %p515_p13 }
 0x2b8   :  { %523 = shalt.err (!%p520_p1)
}
 0x2b9   :  { %382 = dma.vmem_to_hbm [thread:$0]  %s380_s4, 128, %s644_s3, [#allocation4]  }
 0x2ba   :  { %526 = dma.done.wait [#allocation4], 128  }
 0x2bb   :  { %527 = vsyncadd [#allocation4], 4294967168 }
 0x2bc   :  { %386 = vsyncpa [#allocation3], 1 }
 0x2bd   :  { %387 = vsyncpa [#allocation4], 1 }

</bundles_post_ra>
